<compile_context>
chip_gen: v7x
topology: tpu7x:2x2x1
jax: 0.10.0
libtpu: 0.0.40
codegen_flags: <defaults>
</compile_context>

<pallas_src>
import functools

import jax
import jax.numpy as jnp
from jax import lax
from jax.experimental import pallas as pl
from jax.experimental.pallas import tpu as pltpu


def _bus_block_kernel(x_ref, fw_ref, fb_ref, wrr_ref, brr_ref, sr_ref, out_ref,
                      *, bus_channels, s_actual, s_padded):
    # x block: (1, C_in, S_pad) -> squeeze leading batch dim
    x = x_ref[0]                                                    # (C_in, S_pad) f32

    # --- fused 1x1 convs: ONE MXU matmul for write_value and weight -------
    x_mm = x.astype(fw_ref.dtype)                                   # optional bf16 path
    y = jnp.dot(fw_ref[...], x_mm,
                preferred_element_type=jnp.float32) + fb_ref[...]   # (2*C_bus, S_pad)
    write_value = y[:bus_channels, :]                               # (C_bus, S_pad)
    sp = jax.nn.softplus(y[bus_channels:, :])                       # (C_bus, S_pad)

    # Mask out padded spatial positions (static branch: only when S was padded).
    if s_padded != s_actual:
        lane = lax.broadcasted_iota(jnp.int32, (1, s_padded), 1)
        sp = jnp.where(lane < s_actual, sp, 0.0)

    # --- separable pooling: sum(v*w)/(sum(w)+eps), no (C_bus, S) divide ----
    num = jnp.sum(write_value * sp, axis=1, keepdims=True)          # (C_bus, 1)
    den = jnp.sum(sp, axis=1, keepdims=True)                        # (C_bus, 1)
    pooled = num * pl.reciprocal(den + 1e-4, approx=False)          # (C_bus, 1)

    # read_value_map (residue_ratio already folded into wrr/brr in the wrapper)
    pool_value = jnp.dot(wrr_ref[...], pooled,
                         preferred_element_type=jnp.float32) + brr_ref[...]  # (C_in, 1)

    # shortcut + residue (batch_reg=False -> identity)
    out_ref[0] = x * sr_ref[...] + pool_value


def bus_block_pallas(x, params, *, mxu_dtype=None):
    """x: (B, C_in, H, W) float32. Returns (B, C_in, H, W)."""
    B, C_in, H, W = x.shape
    S = H * W
    wv, bv, ww, bw, wr, br, sr, rr = params
    C_bus = wv.shape[0]

    # Pad spatial axis to a multiple of 128 so stores are lane-dense.
    S_pad = ((S + 127) // 128) * 128
    x3 = x.reshape(B, C_in, S)
    if S_pad != S:
        x3 = jnp.pad(x3, ((0, 0), (0, 0), (0, S_pad - S)))

    # Fuse the two 1x1 conv weight sets into a single matmul operand.
    fw = jnp.concatenate([wv, ww], axis=0)            # (2*C_bus, C_in)
    fb = jnp.concatenate([bv, bw], axis=0)            # (2*C_bus, 1)
    if mxu_dtype is not None:
        fw = fw.astype(mxu_dtype)                     # bf16 MXU operands (optional)

    # Fold residue_ratio into the read map: pool_value*rr == (rr*wr)@pooled + rr*br
    wrr = wr * rr                                     # (C_in, C_bus)
    brr = br * rr                                     # (C_in, 1)

    kernel = functools.partial(_bus_block_kernel, bus_channels=C_bus,
                               s_actual=S, s_padded=S_pad)

    # Explicit VMEM accounting: double-buffered in/out blocks + intermediates.
    f32b = 4
    block_bytes = C_in * S_pad * f32b                 # one (C_in, S_pad) f32 tile
    interm_bytes = 4 * C_bus * S_pad * f32b           # fused conv out + softplus slices
    vmem_needed = 2 * 2 * block_bytes + interm_bytes + (2 << 20)
    vmem_limit = int(min(max(vmem_needed, 32 << 20), 64 << 20))
    # TODO(synk): for very large C_in*S (block does not fit the 64 MiB v7x VMEM),
    # tile the spatial axis with num/den accumulators plus a finalize pass.

    const2d = lambda shape: pl.BlockSpec(shape, lambda b: (0, 0))

    out3 = pl.pallas_call(
        kernel,
        out_shape=jax.ShapeDtypeStruct((B, C_in, S_pad), x.dtype),
        grid_spec=pltpu.PrefetchScalarGridSpec(
            num_scalar_prefetch=0,
            grid=(B,),
            in_specs=[
                pl.BlockSpec((1, C_in, S_pad), lambda b: (b, 0, 0)),  # input
                const2d((2 * C_bus, C_in)),                           # fused conv weight
                const2d((2 * C_bus, 1)),                              # fused conv bias
                const2d((C_in, C_bus)),                               # rr * read weight
                const2d((C_in, 1)),                                   # rr * read bias
                const2d((C_in, 1)),                                   # shortcut_ratio
            ],
            out_specs=pl.BlockSpec((1, C_in, S_pad), lambda b: (b, 0, 0)),
        ),
        compiler_params=pltpu.CompilerParams(
            dimension_semantics=("parallel",),
            vmem_limit_bytes=vmem_limit),
    )(x3, fw, fb, wrr, brr, sr)

    if S_pad != S:
        out3 = out3[:, :, :S]
    return out3.reshape(B, C_in, H, W)


def bus_block_reference(x, params):
    """Plain-JAX reference mirroring the PyTorch forward."""
    B, C_in, H, W = x.shape
    S = H * W
    wv, bv, ww, bw, wr, br, sr, rr = params
    x3 = x.reshape(B, C_in, S)
    write_value = jnp.einsum('oc,bcs->bos', wv, x3) + bv[None, :, :]   # (B,C_bus,S)
    weight = jnp.einsum('oc,bcs->bos', ww, x3) + bw[None, :, :]
    w = jax.nn.softplus(weight)
    w = w / (jnp.sum(w, axis=2, keepdims=True) + 1e-4)
    pooled = jnp.sum(write_value * w, axis=2)                          # (B,C_bus)
    pool_value = pooled @ wr.T + br[:, 0][None, :]                     # (B,C_in)
    out = (x3 * sr[None, :, :]
           + pool_value[:, :, None] * rr[None, :, :])
    return out.reshape(B, C_in, H, W)


def make_params(key, in_channels, bus_channels, residue_ratio=0.25):
    ks = jax.random.split(key, 6)
    wv = jax.random.normal(ks[0], (bus_channels, in_channels), jnp.float32) * 0.1
    bv = jax.random.normal(ks[1], (bus_channels, 1), jnp.float32) * 0.1
    ww = jax.random.normal(ks[2], (bus_channels, in_channels), jnp.float32) * 0.1
    bw = jax.random.normal(ks[3], (bus_channels, 1), jnp.float32) * 0.1
    wr = jax.random.normal(ks[4], (in_channels, bus_channels), jnp.float32) * 0.1
    br = jax.random.normal(ks[5], (in_channels, 1), jnp.float32) * 0.1
    sr = jnp.full((in_channels, 1), (1.0 - residue_ratio) ** 0.5, jnp.float32)
    rr = jnp.full((in_channels, 1), residue_ratio ** 0.5, jnp.float32)
    return (wv, bv, ww, bw, wr, br, sr, rr)


if __name__ == "__main__":
    key = jax.random.PRNGKey(0)
    kx1, kx2, kp = jax.random.split(key, 3)

    B, C_in, C_bus = 2, 4, 8
    params = make_params(kp, C_in, C_bus, residue_ratio=0.25)

    # Test 1: S = 16*16 = 256 (already a multiple of 128 -> dense stores path).
    x1 = jax.random.normal(kx1, (B, C_in, 16, 16), jnp.float32)
    out1 = jax.block_until_ready(bus_block_pallas(x1, params))
    ref1 = bus_block_reference(x1, params)
    assert out1.shape == x1.shape
    assert jnp.allclose(out1, ref1, atol=1e-4, rtol=1e-4), "mismatch vs reference (S=256)"

    # Test 2: S = 10*10 = 100 (exercises the pad-to-128 + masked pooling path).
    x2 = jax.random.normal(kx2, (B, C_in, 10, 10), jnp.float32)
    out2 = jax.block_until_ready(bus_block_pallas(x2, params))
    ref2 = bus_block_reference(x2, params)
    assert out2.shape == x2.shape
    assert jnp.allclose(out2, ref2, atol=1e-4, rtol=1e-4), "mismatch vs reference (S=100)"

    print("KERNEL_OK")
</pallas_src>

<mosaic_0001>
module attributes {stable_mosaic.version = 11 : i64} {
  func.func @_bus_block_kernel(%arg0: i32, %arg1: memref<1x4x256xf32, #tpu.memory_space<vmem>>, %arg2: memref<16x4xf32, #tpu.memory_space<vmem>>, %arg3: memref<16x1xf32, #tpu.memory_space<vmem>>, %arg4: memref<4x8xf32, #tpu.memory_space<vmem>>, %arg5: memref<4x1xf32, #tpu.memory_space<vmem>>, %arg6: memref<4x1xf32, #tpu.memory_space<vmem>>, %arg7: memref<1x4x256xf32, #tpu.memory_space<vmem>>) attributes {dimension_semantics = [#tpu.dimension_semantics<parallel>], iteration_bounds = array<i64: 2>, scalar_prefetch = 0 : i64, scratch_operands = 0 : i64, tpu.core_type = #tpu.core_type<tc>, window_params = [{transform_indices = @transform_0, window_bounds = array<i64: 1, 4, 256>}, {pipeline_mode = #tpu.pipeline_mode<synchronous>, transform_indices = @transform_1, window_bounds = array<i64: 16, 4>}, {pipeline_mode = #tpu.pipeline_mode<synchronous>, transform_indices = @transform_2, window_bounds = array<i64: 16, 1>}, {pipeline_mode = #tpu.pipeline_mode<synchronous>, transform_indices = @transform_3, window_bounds = array<i64: 4, 8>}, {pipeline_mode = #tpu.pipeline_mode<synchronous>, transform_indices = @transform_4, window_bounds = array<i64: 4, 1>}, {pipeline_mode = #tpu.pipeline_mode<synchronous>, transform_indices = @transform_5, window_bounds = array<i64: 4, 1>}, {transform_indices = @transform_6, window_bounds = array<i64: 1, 4, 256>}]} {
    %c0 = arith.constant 0 : index
    %c0_0 = arith.constant 0 : index
    %c0_1 = arith.constant 0 : index
    %0 = vector.load %arg1[%c0, %c0_0, %c0_1] : memref<1x4x256xf32, #tpu.memory_space<vmem>>, vector<1x4x256xf32>
    %1 = vector.shape_cast %0 : vector<1x4x256xf32> to vector<4x256xf32>
    %c0_2 = arith.constant 0 : index
    %c0_3 = arith.constant 0 : index
    %2 = vector.load %arg2[%c0_2, %c0_3] : memref<16x4xf32, #tpu.memory_space<vmem>>, vector<16x4xf32>
    %cst = arith.constant dense<0.000000e+00> : vector<16x256xf32>
    %3 = tpu.matmul %2, %1, %cst {dimension_numbers = #tpu.dot_dimension_numbers<[1], [0], [0], [1], [0, 0, 1, 1], [], []>} : vector<16x4xf32>, vector<4x256xf32>, vector<16x256xf32> -> vector<16x256xf32>
    %c0_4 = arith.constant 0 : index
    %c0_5 = arith.constant 0 : index
    %4 = vector.load %arg3[%c0_4, %c0_5] : memref<16x1xf32, #tpu.memory_space<vmem>>, vector<16x1xf32>
    %5 = vector.broadcast %4 : vector<16x1xf32> to vector<16x256xf32>
    %6 = arith.addf %3, %5 : vector<16x256xf32>
    %7 = vector.extract_strided_slice %6 {offsets = [0, 0], sizes = [8, 256], strides = [1, 1]} : vector<16x256xf32> to vector<8x256xf32>
    %8 = vector.extract_strided_slice %6 {offsets = [8, 0], sizes = [8, 256], strides = [1, 1]} : vector<16x256xf32> to vector<8x256xf32>
    %cst_6 = arith.constant 0.000000e+00 : f32
    %9 = vector.broadcast %cst_6 : f32 to vector<8x256xf32>
    %10 = arith.maximumf %8, %9 : vector<8x256xf32>
    %11 = vector.broadcast %cst_6 : f32 to vector<8x256xf32>
    %12 = arith.subf %8, %11 : vector<8x256xf32>
    %13 = arith.cmpf one, %12, %12 : vector<8x256xf32>
    %14 = vector.broadcast %cst_6 : f32 to vector<8x256xf32>
    %15 = arith.addf %8, %14 : vector<8x256xf32>
    %16 = math.absf %12 : vector<8x256xf32>
    %cst_7 = arith.constant 0.000000e+00 : f32
    %17 = vector.broadcast %cst_7 : f32 to vector<8x256xf32>
    %18 = arith.subf %17, %16 : vector<8x256xf32>
    %19 = math.exp %18 : vector<8x256xf32>
    %20 = math.log1p %19 : vector<8x256xf32>
    %21 = arith.addf %10, %20 : vector<8x256xf32>
    %22 = arith.select %13, %15, %21 : vector<8x256xi1>, vector<8x256xf32>
    %23 = arith.mulf %7, %22 : vector<8x256xf32>
    %cst_8 = arith.constant dense<0.000000e+00> : vector<8xf32>
    %24 = vector.multi_reduction <add>, %23, %cst_8 [1] : vector<8x256xf32> to vector<8xf32>
    %25 = vector.shape_cast %24 : vector<8xf32> to vector<8x1xf32>
    %cst_9 = arith.constant dense<0.000000e+00> : vector<8xf32>
    %26 = vector.multi_reduction <add>, %22, %cst_9 [1] : vector<8x256xf32> to vector<8xf32>
    %27 = vector.shape_cast %26 : vector<8xf32> to vector<8x1xf32>
    %cst_10 = arith.constant 9.99999974E-5 : f32
    %28 = vector.broadcast %cst_10 : f32 to vector<8x1xf32>
    %29 = arith.addf %27, %28 : vector<8x1xf32>
    %30 = tpu.reciprocal %29 : vector<8x1xf32> -> vector<8x1xf32>
    %31 = arith.mulf %25, %30 : vector<8x1xf32>
    %c0_11 = arith.constant 0 : index
    %c0_12 = arith.constant 0 : index
    %32 = vector.load %arg4[%c0_11, %c0_12] : memref<4x8xf32, #tpu.memory_space<vmem>>, vector<4x8xf32>
    %cst_13 = arith.constant dense<0.000000e+00> : vector<4x1xf32>
    %33 = tpu.matmul %32, %31, %cst_13 {dimension_numbers = #tpu.dot_dimension_numbers<[1], [0], [0], [1], [0, 0, 1, 1], [], []>} : vector<4x8xf32>, vector<8x1xf32>, vector<4x1xf32> -> vector<4x1xf32>
    %c0_14 = arith.constant 0 : index
    %c0_15 = arith.constant 0 : index
    %34 = vector.load %arg5[%c0_14, %c0_15] : memref<4x1xf32, #tpu.memory_space<vmem>>, vector<4x1xf32>
    %35 = arith.addf %33, %34 : vector<4x1xf32>
    %c0_16 = arith.constant 0 : index
    %c0_17 = arith.constant 0 : index
    %36 = vector.load %arg6[%c0_16, %c0_17] : memref<4x1xf32, #tpu.memory_space<vmem>>, vector<4x1xf32>
    %37 = vector.broadcast %36 : vector<4x1xf32> to vector<4x256xf32>
    %38 = arith.mulf %1, %37 : vector<4x256xf32>
    %39 = vector.broadcast %35 : vector<4x1xf32> to vector<4x256xf32>
    %40 = arith.addf %38, %39 : vector<4x256xf32>
    %c0_18 = arith.constant 0 : index
    %c0_19 = arith.constant 0 : index
    %c0_20 = arith.constant 0 : index
    %41 = vector.load %arg7[%c0_18, %c0_19, %c0_20] : memref<1x4x256xf32, #tpu.memory_space<vmem>>, vector<1x4x256xf32>
    %42 = vector.shape_cast %41 : vector<1x4x256xf32> to vector<4x256xf32>
    %43 = vector.shape_cast %40 : vector<4x256xf32> to vector<1x4x256xf32>
    tpu.vector_store %arg7[%c0_18, %c0_19, %c0_20], %43 {strides = array<i32>} : memref<1x4x256xf32, #tpu.memory_space<vmem>>, vector<1x4x256xf32>,
    return
  }
  func.func @transform_0(%arg0: i32) -> (i32, i32, i32) {
    %c0_i32 = arith.constant 0 : i32
    %c0_i32_0 = arith.constant 0 : i32
    %c0_i32_1 = arith.constant 0 : i32
    return %arg0, %c0_i32, %c0_i32_0 : i32, i32, i32
  }
  func.func @transform_1(%arg0: i32) -> (i32, i32) {
    %c0_i32 = arith.constant 0 : i32
    %c0_i32_0 = arith.constant 0 : i32
    %c0_i32_1 = arith.constant 0 : i32
    return %c0_i32, %c0_i32_0 : i32, i32
  }
  func.func @transform_2(%arg0: i32) -> (i32, i32) {
    %c0_i32 = arith.constant 0 : i32
    %c0_i32_0 = arith.constant 0 : i32
    %c0_i32_1 = arith.constant 0 : i32
    return %c0_i32, %c0_i32_0 : i32, i32
  }
  func.func @transform_3(%arg0: i32) -> (i32, i32) {
    %c0_i32 = arith.constant 0 : i32
    %c0_i32_0 = arith.constant 0 : i32
    %c0_i32_1 = arith.constant 0 : i32
    return %c0_i32, %c0_i32_0 : i32, i32
  }
  func.func @transform_4(%arg0: i32) -> (i32, i32) {
    %c0_i32 = arith.constant 0 : i32
    %c0_i32_0 = arith.constant 0 : i32
    %c0_i32_1 = arith.constant 0 : i32
    return %c0_i32, %c0_i32_0 : i32, i32
  }
  func.func @transform_5(%arg0: i32) -> (i32, i32) {
    %c0_i32 = arith.constant 0 : i32
    %c0_i32_0 = arith.constant 0 : i32
    %c0_i32_1 = arith.constant 0 : i32
    return %c0_i32, %c0_i32_0 : i32, i32
  }
  func.func @transform_6(%arg0: i32) -> (i32, i32, i32) {
    %c0_i32 = arith.constant 0 : i32
    %c0_i32_0 = arith.constant 0 : i32
    %c0_i32_1 = arith.constant 0 : i32
    return %arg0, %c0_i32, %c0_i32_0 : i32, i32, i32
  }
}

</mosaic_0001>

<bundles_post_ra>
// kernel: tpu_custom_call.1
= control target key start
LH: loop header
LB: loop body
LE: loop exit
PB: predicated region body
PF: predicated region fallthrough
CT: control target
= control target key end

     0   :  { %11 = vsyncpa [#allocation3], 0  ;;  %s898_s0 = inlined_call_operand.vmem [shape: f32[2,4,256], index: 0, kind: input, shape index: {}]   ;;  %s899_s1 = inlined_call_operand.vmem [shape: f32[16,4], index: 1, kind: input, shape index: {}]   ;;  %s900_s2 = inlined_call_operand.vmem [shape: f32[16,1], index: 2, kind: input, shape index: {}]   ;;  %s901_s3 = inlined_call_operand.vmem [shape: f32[4,8], index: 3, kind: input, shape index: {}]   ;;  %s902_s4 = inlined_call_operand.vmem [shape: f32[4,1], index: 4, kind: input, shape index: {}]   ;;  %s903_s5 = inlined_call_operand.vmem [shape: f32[4,1], index: 5, kind: input, shape index: {}]   ;;  %s904_s6 = inlined_call_operand.hbm [shape: f32[2,4,256], index: 6, kind: output, shape index: {}]  }
   0x1   :  { %13 = vsyncpa [#allocation3 + $0x1], 0  ;;  %s767_s21 = smov 0   ;;  %s769_s22 = smov 0  }
   0x2   :  { %s771_s23 = smov 0   ;;  %s773_s24 = smov 0  }
   0x3 LB: > { %s788_s25 = sadd.s32 4294967295, %s725_s24   ;;  %s581_s26 = sadd.s32 4294967294, %s725_s24   ;;  %s725_s24 = sphi %s773_s24, %s910_s24   ;;  %s721_s23 = sphi %s771_s23, %s909_s23   ;;  %s717_s22 = sphi %s769_s22, %s908_s22   ;;  %s713_s21 = sphi %s767_s21, %s907_s21  }
   0x4   : > { %s792_s27 = sadd.s32 1, %s725_s24   ;;  %s157_s28 = sadd.s32 1, %s721_s23 }
   0x5   : > { %s154_s29 = ssub.s32 %s725_s24, %s792_s27  ;;  %p167_p0 = scmp.ne.s32.totalorder %s721_s23, %s717_s22 }
   0x6   : > { %p155_p1 = scmp.eq.s32.totalorder %s154_s29, 0  ;;  %p168_p2 = scmp.eq.s32.totalorder %s788_s25, 1 }
   0x7   : > { %p173_p3 = scmp.ne.s32.totalorder %s717_s22, %s713_s21  ;;  %p174_p4 = scmp.eq.s32.totalorder %s581_s26, 1 }
   0x8   : > { %s803_s30 = scalar_select %p155_p1, %s721_s23, %s157_s28  }
   0x9   : > { %p805_p5 = por %p168_p2, %p167_p0  ;;  %p809_p6 = por %p174_p4, %p173_p3 }
   0xa   : > { %p584_p7 = scmp.ge.s32.totalorder %s725_s24, 1  ;;  %p215_p8 = scmp.lt.s32.totalorder %s725_s24, 3 }
   0xc   : > { %p216_p9 = pnand %p584_p7, %p215_p8 }
   0xd   : > { %p245_p10 = scmp.lt.s32.totalorder (!%p216_p9), %s788_s25, 1  ;;  %v727_v0 = vmov (!%p216_p9), 0.0   ;;  %v254_v1 = vld [vmem:[%s900_s2 + $0x8] sm:$0xff] (!%p216_p9)  ;;  %v728_v2 = vmov (!%p216_p9), 0   ;;  %v253_v3 = vld [vmem:[%s900_s2] sm:$0xff] (!%p216_p9)  ;;  %vm274_vm0 = vcmask (!%p216_p9), 1043456  }
   0xe   : > { %219 = sbr.rel (%p216_p9) target bundleno = 805 (0x325), region = 44  ;;  %343 = vmatprep.mubr.f32.mxu0 (!%p216_p9), %v727_v0  ;;  %602 = vmatprep.subr.mxu1 (!%p216_p9), %v727_v0  ;;  %v251_v6 = vld [vmem:[%s899_s1] sm:$0xff] (!%p216_p9)  ;;  %vm267_vm1 = vcmask (!%p216_p9), 31744   ;;  %v252_v8 = vld [vmem:[%s899_s1 + $0x8] sm:$0xff] (!%p216_p9)  ;;  %vm729_vm6 = vmmov (!%p216_p9), 0   ;;  %vm405_vm7 = vcmask (!%p216_p9), 64512  }
   0xf   : > { %650 = vset.pattern.permute.xlu0 (!%p216_p9), %v728_v2  ;;  %651 = vset.pattern.permute.xlu1 (!%p216_p9), %v728_v2  ;;  %v479_v7 = vld [vmem:[%s903_s5] sm:$0xf] (!%p216_p9)  ;;  %v730_v63 = vmov (!%p216_p9), 839922192   ;;  %s242_s13 = sand.u32 (!%p216_p9), 1, %s717_s22   ;;  %s599_s15 = sshll.u32 (!%p216_p9), %s788_s25, 7 }
  0x10   : > { %262 = vperm.xlu0 (!%p216_p9), %650, %v254_v1   ;;  %604 = vmatprep.mubr.msk.f32.mxu1 (!%p216_p9), %vm729_vm6, %v727_v0  ;;  %v403_v58 = vld [vmem:[%s901_s3] sm:$0xf] (!%p216_p9)  ;;  %v487_v1 = vlaneseq (!%p216_p9)  ;;  %s585_s14 = sshll.u32 (!%p216_p9), %s242_s13, 3  ;;  %s856_s20 = scalar_lea.hbm (!%p216_p9), %s904_s6, %s599_s15 }
  0x11   : > { %v404_v59 = vld [vmem:[%s902_s4] sm:$0xf] (!%p216_p9)  ;;  %s244_s16 = scalar_lea.vmem (!%p216_p9), [#allocation2], %s585_s14  ;;  %s508_s26 = scalar_lea.sflag (!%p216_p9), [#allocation3], %s242_s13 }
  0x14   : > { %257 = vperm.xlu0 (!%p216_p9), %650, %v253_v3   ;;  %v488_v3 = vshrl.u32 (!%p216_p9), %v487_v1, 7 }
  0x15   : > { %s246_s11 = scalar_select %p245_p10, %s788_s25, 1 }
  0x16   : > { %s731_s25 = smov [#allocation2]  }
  0x17   : > { %s598_s12 = sshll.u32 %s246_s11, 3  ;;  %s667_s29 = sshll.u32 %s731_s25, 4  ;;  %s668_s29 = int_to_ptr.vmem [resolvable:$false] %s667_s29 }
  0x18   : > { %s249_s17 = scalar_lea.vmem %s898_s0, %s598_s12  ;;  %482 = vperm.xlu0 %650, %v479_v7   ;;  %s669_s9 = scalar_lea.vmem %s668_s29, 256 }
  0x19   : > { %v828_v4 = vld [vmem:[%s249_s17] sm:$0xff]  ;;  %s522_s17 = sshll.u32 %s244_s16, 4  ;;  %s858_s17 = int_to_ptr.vmem [resolvable:$true] %s522_s17 }
  0x1a   : > { %v266_v5 = vcombine.high %v828_v4, %v828_v4  ;;  %s663_s28 = scalar_lea.vmem %s858_s17, 128  ;;  %p670_p0 = scmp.lt.s32.totalorder %s858_s17, %s668_s29 }
  0x1b   : > { %p664_p11 = scmp.ne.s32.totalorder %s858_s17, %s663_s28  ;;  %p671_p1 = scmp.lt.s32.totalorder %s669_s9, %s663_s28 }
  0x1c   : > { %588 = vmatprep.subr.msk.mxu0 %vm274_vm0, %v266_v5 }
  0x1d   : > { %589 = vmatpush1.msk.msra.mxu0 %vm274_vm0, %v828_v4  ;;  %p665_p12 = pnand %p664_p11, %p805_p5  ;;  %p672_p2 = por %p671_p1, %p670_p0 }
  0x1e   : > { %590 = vmatmul.mubr.msk.f32.vlgmr.msra.gmra.mrb[0].mxu0 %vm267_vm1, %v251_v6 }
  0x1f   : > { %349 = vmatprep.mubr.f32.mxu0 %v727_v0  ;;  %v485_v0 = vunpack.c.l.s4 %v730_v63  ;;  %p666_p13 = pneg %p665_p12 }
  0x21   : > { %v486_v2 = vunpack.c.0.s8 %v485_v0  ;;  %p673_p3 = pnand %p672_p2, %p666_p13 }
  0x22   : > { %591 = vmatmul.mubr.msk.f32.gmra.mrb[2].mxu0 %vm267_vm1, %v252_v8 }
  0x23   : > { %v489_v5 = vsub.s32 %v486_v2, %v488_v3 }
  0x8f   : > { %v263_v11 = vpop.permute.xlu0 %262 }
  0x93   : > { %v258_v36 = vpop.permute.xlu0 %257 }
  0x97   : > { %v483_v6 = vpop.permute.xlu0 %482 }
  0x98   : > { %v490_v7 = vrot.slane %v483_v6, %v489_v5 }
  0xf1   : > { %v345_v9 = vpop.f32.mrb[0].mxu0 }
  0xf2   : > { %v347_v10 = vpop.f32.mrb[1].mxu0  ;;  %v346_v44 = vadd.f32 %v345_v9, %v258_v36  ;;  %v492_v9 = vmul.f32 %v490_v7, %v828_v4 }
  0xf3   : > { %v348_v46 = vadd.f32 %v347_v10, %v258_v36 }
  0xf5   : > { %v351_v12 = vpop.f32.mrb[2].mxu0 }
  0xf6   : > { %v352_v13 = vadd.f32 %v351_v12, %v263_v11  ;;  %v353_v14 = vpop.f32.mrb[3].mxu0 }
  0xf7   : > { %v354_v15 = vadd.f32 %v353_v14, %v263_v11 }
  0xf8   : > { %v362_v16 = vand.u32 2147483647, %v352_v13  ;;  %v356_v37 = vmax.f32 %v352_v13, 0.0  ;;  %vm358_vm4 = vcmp.ne.f32.partialorder %v352_v13, %v352_v13 }
  0xf9   : > { %v363_v17 = vand.u32 2147483647, %v354_v15  ;;  %v357_v40 = vmax.f32 %v354_v15, 0.0  ;;  %vm359_vm5 = vcmp.ne.f32.partialorder %v354_v15, %v354_v15 }
  0xfa   : > { %v364_v18 = vsub.f32 0.0, %v362_v16 }
  0xfb   : > { %v365_v19 = vsub.f32 0.0, %v363_v17 }
  0xfc   : > { %v366_v20 = vmul.f32 1.442695, %v364_v18 }
  0xfd   : > { %v368_v21 = vmul.f32 1.442695, %v365_v19 }
  0xfe   : > { %653 = vpow2.f32 %v366_v20 }
  0xff   : > { %655 = vpow2.f32 %v368_v21 }
 0x108   : > { %v654_v22 = vpop.eup %653 }
 0x109   : > { %v656_v23 = vpop.eup %655  ;;  %v370_v24 = vadd.f32 1.0, %v654_v22  ;;  %v373_v26 = vmul.f32 -0.5, %v654_v22  ;;  %v376_v29 = vand.u32 2147483647, %v654_v22 }
 0x10a   : > { %v379_v25 = vadd.f32 1.0, %v656_v23  ;;  %v382_v27 = vmul.f32 -0.5, %v656_v23  ;;  %v385_v31 = vand.u32 2147483647, %v656_v23 }
 0x10b   : > { %657 = vlog2.f32 %v370_v24  ;;  %v374_v28 = vadd.f32 1.0, %v373_v26  ;;  %vm377_vm2 = vcmp.lt.f32.partialorder %v376_v29, 0.0004427343 }
 0x10c   : > { %659 = vlog2.f32 %v379_v25  ;;  %v383_v30 = vadd.f32 1.0, %v382_v27  ;;  %vm386_vm3 = vcmp.lt.f32.partialorder %v385_v31, 0.0004427343 }
 0x10d   : > { %v375_v35 = vmul.f32 %v654_v22, %v374_v28 }
 0x10e   : > { %v384_v39 = vmul.f32 %v656_v23, %v383_v30 }
 0x115   : > { %v658_v32 = vpop.eup %657 }
 0x116   : > { %v660_v33 = vpop.eup %659  ;;  %v372_v34 = vmul.f32 0.6931472, %v658_v32 }
 0x117   : > { %v381_v38 = vmul.f32 0.6931472, %v660_v33 }
 0x118   : > { %v378_v41 = vsel %vm377_vm2, %v375_v35, %v372_v34 }
 0x119   : > { %v387_v42 = vsel %vm386_vm3, %v384_v39, %v381_v38  ;;  %v388_v43 = vadd.f32 %v378_v41, %v356_v37 }
 0x11a   : > { %v389_v45 = vadd.f32 %v387_v42, %v357_v40 }
 0x11b   : > { %v390_v47 = vsel %vm358_vm4, %v352_v13, %v388_v43 }
 0x11c   : > { %v391_v48 = vsel %vm359_vm5, %v354_v15, %v389_v45  ;;  %v392_v49 = vmul.f32 %v390_v47, %v346_v44 }
 0x11d   : > { %v397_v50 = vadd.f32 %v391_v48, %v390_v47  ;;  %v393_v51 = vmul.f32 %v391_v48, %v348_v46 }
 0x11f   : > { %398 = vadd.xlane.f32.xlu1 %v397_v50  ;;  %v394_v52 = vadd.f32 %v393_v51, %v392_v49 }
 0x123   : > { %395 = vadd.xlane.f32.xlu1 %v394_v52 }
 0x1ac   : > { %v399_v53 = vpop.xlane.xlu1 %398 }
 0x1ad   : > { %v400_v54 = vadd.f32 0.0001, %v399_v53 }
 0x1af   : > { %661 = vrcp.f32 %v400_v54 }
 0x1b0   : > { %v396_v56 = vpop.xlane.xlu1 %395 }
 0x1b9   : > { %v662_v55 = vpop.eup %661 }
 0x1ba   : > { %v402_v57 = vmul.f32 %v662_v55, %v396_v56 }
 0x1bc   : > { %603 = vmatpush3.msra.mxu1 %v402_v57 }
 0x1bd   : > { %605 = vmatmul.mubr.msk.f32.vlgmr.msra.gmra.mrb[0].mxu1 %vm405_vm7, %v403_v58 }
 0x290   : > { %v475_v60 = vpop.f32.mrb[0].mxu1 }
 0x291   : > { %v476_v61 = vadd.f32 %v475_v60, %v404_v59  ;;  %v606_v62 = vpop.f32.mrb[1].mxu1 }
 0x293   : > { %495 = vperm.xlu1 %651, %v476_v61  }
 0x312   : > { %v496_v8 = vpop.permute.xlu1 %495 }
 0x313   : > { %v503_v10 = vrot.slane %v496_v8, %v489_v5 }
 0x315   : > { %v505_v11 = vadd.f32 %v503_v10, %v492_v9 }
 0x317   : > { %506 = vst [vmem:[%s244_s16] sm:$0xff] %v505_v11 }
 0x318   : > { %676 = shalt.err (!%p673_p3)
}
 0x319   : > { %s677_s10 = scalar_lea.hbm %s856_s20, 128  ;;  %s681_s13 = scalar_lea.hbm %s904_s6, 256 }
 0x31a   : > { %p678_p4 = scmp.ne.s32.totalorder %s856_s20, %s677_s10  ;;  %p682_p9 = scmp.lt.u32.totalorder %s856_s20, %s904_s6 }
 0x31b   : > { %p683_p10 = scmp.lt.u32.totalorder %s681_s13, %s677_s10  ;;  %p685_p12 = scmp.lt.u32.totalorder %s677_s10, %s856_s20 }
 0x31c   : > { %p679_p7 = pnand %p678_p4, %p805_p5 }
 0x31d   : > { %p684_p11 = por %p683_p10, %p682_p9 }
 0x31e   : > { %p680_p8 = pneg %p679_p7 }
 0x31f   : > { %p686_p13 = por %p685_p12, %p684_p11 }
 0x321   : > { %p687_p0 = pnand %p686_p13, %p680_p8 }
 0x323   : > { %690 = shalt.err (!%p687_p0)
}
 0x324   : > { %607 = dma.vmem_to_hbm [thread:$0]  (%p805_p5), %s858_s17, 128, %s856_s20, %s508_s26  }
 0x325 PF: > { %p613_p1 = scmp.ge.s32.totalorder %s725_s24, 2  ;;  %s534_s16 = sand.u32 1, %s713_s21  }
 0x326   : > { %s535_s18 = scalar_lea.sflag [#allocation3], %s534_s16 }
 0x327   : > { %p610_p2 = pnand %p613_p1, %p809_p6 }
 0x329   : > { %708 = dma.done.wait (!%p610_p2), %s535_s18, 128  }
 0x32a   : > { %710 = vsyncadd (!%p610_p2), %s535_s18, 4294967168  ;;  %p16_p3 = scmp.ge.s32.totalorder %s792_s27, 4   ;;  %s907_s21 = smov %s717_s22 }
 0x32b   : > { %s908_s22 = smov %s721_s23  ;;  %s909_s23 = smov %s803_s30 }
 0x32c   : > { %s910_s24 = smov %s792_s27  ;;  %18 = sbr.rel (!%p16_p3) target bundleno = 3 (0x3), region = 79 }
 0x333   :  { %540 = vsyncpa [#allocation3], 1 }
 0x334   :  { %542 = vsyncpa [#allocation3 + $0x1], 1 }

</bundles_post_ra>
